<compile_context>
chip_gen: v7x
topology: tpu7x:2x2x1
jax: 0.10.0
libtpu: 0.0.40
codegen_flags: <defaults>
</compile_context>

<pallas_src>
import functools

import jax
import jax.numpy as jnp
from jax.experimental import pallas as pl
from jax.experimental.pallas import tpu as pltpu


def _decoder_kernel(num_layers, hidden_dim, *refs):
    """refs (num_layers > 1):
         xg, hidden, cell, w_hh_0, w_cat, b, fc_w, fc_b, pred, h_out, c_out
       refs (num_layers == 1):
         xg, hidden, cell, w_hh_0,        b, fc_w, fc_b, pred, h_out, c_out
    """
    if num_layers > 1:
        (xg_ref, h_ref, c_ref, w_hh0_ref, w_cat_ref, b_ref, fc_w_ref, fc_b_ref,
         pred_ref, h_out_ref, c_out_ref) = refs
    else:
        (xg_ref, h_ref, c_ref, w_hh0_ref, b_ref, fc_w_ref, fc_b_ref,
         pred_ref, h_out_ref, c_out_ref) = refs
        w_cat_ref = None

    H = hidden_dim

    def lstm_cell(gates, c_prev):
        # all elementwise gate math stays in f32 (v5e has no bf16 VPU/EUP path)
        i_g = jax.nn.sigmoid(gates[:, 0 * H:1 * H])
        f_g = jax.nn.sigmoid(gates[:, 1 * H:2 * H])
        g_g = jnp.tanh(gates[:, 2 * H:3 * H])
        o_g = jax.nn.sigmoid(gates[:, 3 * H:4 * H])
        c_new = f_g * c_prev + i_g * g_g
        h_new = o_g * jnp.tanh(c_new)
        return h_new, c_new

    # ---- layer 0: x @ w_ih_0 is already folded into the gathered table rows ----
    h_prev = h_ref[0]                       # (B, H) f32
    c_prev = c_ref[0]
    gates = (
        xg_ref[...]                         # (B, 4H) f32  (= emb @ w_ih_0 rows)
        + jnp.dot(h_prev.astype(jnp.bfloat16), w_hh0_ref[...],
                  preferred_element_type=jnp.float32)
        + b_ref[0]                          # (1, 4H) f32  (= b_ih + b_hh)
    )
    x, c_new = lstm_cell(gates, c_prev)
    h_out_ref[0] = x
    c_out_ref[0] = c_new

    # ---- layers 1..L-1: one fused dot per layer on concat([x, h_prev]) ----
    for l in range(1, num_layers):
        h_prev = h_ref[l]
        c_prev = c_ref[l]
        x_cat = jnp.concatenate([x, h_prev], axis=-1).astype(jnp.bfloat16)  # (B, 2H)
        gates = (
            jnp.dot(x_cat, w_cat_ref[l - 1],            # (2H, 4H) bf16
                    preferred_element_type=jnp.float32)
            + b_ref[l]
        )
        x, c_new = lstm_cell(gates, c_prev)
        h_out_ref[l] = x
        c_out_ref[l] = c_new

    # TODO(synk): nn.LSTM inter-layer dropout is train-mode only; this kernel
    # implements the eval-mode forward (dropout == identity).

    # ---- fc + LogSoftmax(dim=1) ----
    logits = (
        jnp.dot(x.astype(jnp.bfloat16), fc_w_ref[...],
                preferred_element_type=jnp.float32)
        + fc_b_ref[...]
    )
    m = jnp.max(logits, axis=1, keepdims=True)
    z = logits - m
    lse = jnp.log(jnp.sum(jnp.exp(z), axis=1, keepdims=True))
    pred_ref[...] = z - lse


def _full_spec(shape):
    nd = len(shape)
    return pl.BlockSpec(shape, lambda i, _nd=nd: (0,) * _nd)


@functools.partial(jax.jit, static_argnames=("num_layers", "hidden_dim"))
def decoder_forward(tokens, hidden, cell, prep, *, num_layers, hidden_dim):
    # data-dependent gather (embedding lookup with w_ih_0 pre-folded) -> JAX glue
    emb_gates = jnp.take(prep["emb_fold"], tokens, axis=0)   # (B, 4H) f32

    B = tokens.shape[0]
    L, _, H = hidden.shape
    V = prep["fc_w"].shape[1]
    assert L == num_layers and H == hidden_dim

    inputs = [emb_gates, hidden, cell, prep["w_hh_0"]]
    if num_layers > 1:
        inputs.append(prep["w_cat"])
    inputs += [prep["b"], prep["fc_w"], prep["fc_b"]]
    in_specs = [_full_spec(a.shape) for a in inputs]

    out_shape = (
        jax.ShapeDtypeStruct((B, V), jnp.float32),      # log-probs
        jax.ShapeDtypeStruct((L, B, H), jnp.float32),   # new hidden
        jax.ShapeDtypeStruct((L, B, H), jnp.float32),   # new cell
    )
    out_specs = (
        _full_spec((B, V)),
        _full_spec((L, B, H)),
        _full_spec((L, B, H)),
    )

    kernel = functools.partial(_decoder_kernel, num_layers, hidden_dim)
    return pl.pallas_call(
        kernel,
        out_shape=out_shape,
        grid=(1,),
        in_specs=in_specs,
        out_specs=out_specs,
        # recurrent state updated in place: hidden -> new hidden, cell -> new cell
        input_output_aliases={1: 1, 2: 2},
        compiler_params=pltpu.CompilerParams(
            dimension_semantics=("arbitrary",),
        ),
    )(*inputs)


def prepare_params(params, num_layers, hidden_dim):
    """Pack PyTorch-layout f32 params into the kernel-optimized set."""
    prep = {}
    # layer-0 input projection folded into the embedding table: (V, 4H) f32
    prep["emb_fold"] = (params["embedding"] @ params["w_ih_0"]).astype(jnp.float32)
    prep["w_hh_0"] = params["w_hh_0"].astype(jnp.bfloat16)            # (H, 4H)
    if num_layers > 1:
        prep["w_cat"] = jnp.stack([                                    # (L-1, 2H, 4H)
            jnp.concatenate([params[f"w_ih_{l}"], params[f"w_hh_{l}"]], axis=0)
            for l in range(1, num_layers)
        ]).astype(jnp.bfloat16)
    prep["b"] = jnp.stack(                                             # (L, 1, 4H) f32
        [params[f"b_{l}"] for l in range(num_layers)]
    ).astype(jnp.float32)
    prep["fc_w"] = params["fc_w"].astype(jnp.bfloat16)                 # (H, V)
    prep["fc_b"] = params["fc_b"].astype(jnp.float32)                  # (1, V)
    return prep


def _reference_forward(tokens, hidden, cell, params, *, num_layers, hidden_dim):
    """Pure-JAX f32 reference mirroring the PyTorch forward (eval mode)."""
    H = hidden_dim
    x = params["embedding"][tokens].astype(jnp.float32)
    new_h, new_c = [], []
    for l in range(num_layers):
        gates = x @ params[f"w_ih_{l}"] + hidden[l] @ params[f"w_hh_{l}"] + params[f"b_{l}"]
        i_g = jax.nn.sigmoid(gates[:, 0 * H:1 * H])
        f_g = jax.nn.sigmoid(gates[:, 1 * H:2 * H])
        g_g = jnp.tanh(gates[:, 2 * H:3 * H])
        o_g = jax.nn.sigmoid(gates[:, 3 * H:4 * H])
        c_new = f_g * cell[l] + i_g * g_g
        h_new = o_g * jnp.tanh(c_new)
        new_h.append(h_new)
        new_c.append(c_new)
        x = h_new
    logits = x @ params["fc_w"] + params["fc_b"]
    preds = jax.nn.log_softmax(logits, axis=1)
    return preds, jnp.stack(new_h), jnp.stack(new_c)


def make_params(key, output_dim, embedding_dim, hidden_dim, num_layers):
    """Deterministic synthetic parameters (PyTorch-like uniform init), f32."""
    params = {}
    k = 1.0 / jnp.sqrt(jnp.float32(hidden_dim))
    keys = jax.random.split(key, 3 * num_layers + 3)
    params["embedding"] = jax.random.normal(
        keys[0], (output_dim, embedding_dim), jnp.float32
    )
    idx = 1
    for l in range(num_layers):
        in_dim = embedding_dim if l == 0 else hidden_dim
        params[f"w_ih_{l}"] = jax.random.uniform(
            keys[idx], (in_dim, 4 * hidden_dim), jnp.float32, -k, k
        )
        params[f"w_hh_{l}"] = jax.random.uniform(
            keys[idx + 1], (hidden_dim, 4 * hidden_dim), jnp.float32, -k, k
        )
        # combined bias = b_ih + b_hh
        params[f"b_{l}"] = jax.random.uniform(
            keys[idx + 2], (1, 4 * hidden_dim), jnp.float32, -2 * k, 2 * k
        )
        idx += 3
    params["fc_w"] = jax.random.uniform(
        keys[idx], (hidden_dim, output_dim), jnp.float32, -k, k
    )
    params["fc_b"] = jax.random.uniform(
        keys[idx + 1], (1, output_dim), jnp.float32, -k, k
    )
    return params


if __name__ == "__main__":
    OUTPUT_DIM = 256   # vocab size
    EMBED_DIM = 32
    HIDDEN_DIM = 128
    NUM_LAYERS = 2
    BATCH = 8

    root = jax.random.PRNGKey(0)
    k_par, k_tok, k_h, k_c = jax.random.split(root, 4)

    params = make_params(k_par, OUTPUT_DIM, EMBED_DIM, HIDDEN_DIM, NUM_LAYERS)
    prep = prepare_params(params, NUM_LAYERS, HIDDEN_DIM)

    tokens = jax.random.randint(k_tok, (BATCH,), 0, OUTPUT_DIM, jnp.int32)
    hidden = jax.random.normal(k_h, (NUM_LAYERS, BATCH, HIDDEN_DIM), jnp.float32)
    cell = jax.random.normal(k_c, (NUM_LAYERS, BATCH, HIDDEN_DIM), jnp.float32)

    # f32 reference of the PyTorch eval-mode forward (computed before the kernel
    # runs since the recurrent state is aliased/donated to the outputs).
    preds_r, h_r, c_r = _reference_forward(
        tokens, hidden, cell, params, num_layers=NUM_LAYERS, hidden_dim=HIDDEN_DIM
    )
    jax.block_until_ready((preds_r, h_r, c_r))

    preds, h_new, c_new = decoder_forward(
        tokens, hidden, cell, prep, num_layers=NUM_LAYERS, hidden_dim=HIDDEN_DIM
    )
    jax.block_until_ready((preds, h_new, c_new))

    # bf16 weights on the MXU -> looser tolerance vs. the pure-f32 reference
    assert jnp.allclose(preds, preds_r, atol=5e-2, rtol=5e-2), \
        float(jnp.max(jnp.abs(preds - preds_r)))
    assert jnp.allclose(h_new, h_r, atol=5e-2, rtol=5e-2), \
        float(jnp.max(jnp.abs(h_new - h_r)))
    assert jnp.allclose(c_new, c_r, atol=5e-2, rtol=5e-2), \
        float(jnp.max(jnp.abs(c_new - c_r)))

    print("KERNEL_OK")
</pallas_src>

<mosaic_0001>
module attributes {stable_mosaic.version = 11 : i64} {
  func.func @_decoder_kernel(%arg0: i32, %arg1: memref<8x512xf32, #tpu.memory_space<vmem>>, %arg2: memref<2x8x128xf32, #tpu.memory_space<vmem>>, %arg3: memref<2x8x128xf32, #tpu.memory_space<vmem>>, %arg4: memref<128x512xbf16, #tpu.memory_space<vmem>>, %arg5: memref<1x256x512xbf16, #tpu.memory_space<vmem>>, %arg6: memref<2x1x512xf32, #tpu.memory_space<vmem>>, %arg7: memref<128x256xbf16, #tpu.memory_space<vmem>>, %arg8: memref<1x256xf32, #tpu.memory_space<vmem>>, %arg9: memref<8x256xf32, #tpu.memory_space<vmem>>, %arg10: memref<2x8x128xf32, #tpu.memory_space<vmem>>, %arg11: memref<2x8x128xf32, #tpu.memory_space<vmem>>) attributes {dimension_semantics = [#tpu.dimension_semantics<arbitrary>], iteration_bounds = array<i64: 1>, scalar_prefetch = 0 : i64, scratch_operands = 0 : i64, tpu.core_type = #tpu.core_type<tc>, window_params = [{pipeline_mode = #tpu.pipeline_mode<synchronous>, transform_indices = @transform_0, window_bounds = array<i64: 8, 512>}, {pipeline_mode = #tpu.pipeline_mode<synchronous>, transform_indices = @transform_1, window_bounds = array<i64: 2, 8, 128>}, {pipeline_mode = #tpu.pipeline_mode<synchronous>, transform_indices = @transform_2, window_bounds = array<i64: 2, 8, 128>}, {pipeline_mode = #tpu.pipeline_mode<synchronous>, transform_indices = @transform_3, window_bounds = array<i64: 128, 512>}, {pipeline_mode = #tpu.pipeline_mode<synchronous>, transform_indices = @transform_4, window_bounds = array<i64: 1, 256, 512>}, {pipeline_mode = #tpu.pipeline_mode<synchronous>, transform_indices = @transform_5, window_bounds = array<i64: 2, 1, 512>}, {pipeline_mode = #tpu.pipeline_mode<synchronous>, transform_indices = @transform_6, window_bounds = array<i64: 128, 256>}, {pipeline_mode = #tpu.pipeline_mode<synchronous>, transform_indices = @transform_7, window_bounds = array<i64: 1, 256>}, {pipeline_mode = #tpu.pipeline_mode<synchronous>, transform_indices = @transform_8, window_bounds = array<i64: 8, 256>}, {pipeline_mode = #tpu.pipeline_mode<synchronous>, transform_indices = @transform_9, window_bounds = array<i64: 2, 8, 128>}, {pipeline_mode = #tpu.pipeline_mode<synchronous>, transform_indices = @transform_10, window_bounds = array<i64: 2, 8, 128>}]} {
    %c0 = arith.constant 0 : index
    %c0_0 = arith.constant 0 : index
    %c0_1 = arith.constant 0 : index
    %0 = vector.load %arg2[%c0, %c0_0, %c0_1] : memref<2x8x128xf32, #tpu.memory_space<vmem>>, vector<1x8x128xf32>
    %1 = vector.shape_cast %0 : vector<1x8x128xf32> to vector<8x128xf32>
    %c0_2 = arith.constant 0 : index
    %c0_3 = arith.constant 0 : index
    %c0_4 = arith.constant 0 : index
    %2 = vector.load %arg3[%c0_2, %c0_3, %c0_4] : memref<2x8x128xf32, #tpu.memory_space<vmem>>, vector<1x8x128xf32>
    %3 = vector.shape_cast %2 : vector<1x8x128xf32> to vector<8x128xf32>
    %c0_5 = arith.constant 0 : index
    %c0_6 = arith.constant 0 : index
    %4 = vector.load %arg1[%c0_5, %c0_6] : memref<8x512xf32, #tpu.memory_space<vmem>>, vector<8x512xf32>
    %5 = arith.truncf %1 : vector<8x128xf32> to vector<8x128xbf16>
    %c0_7 = arith.constant 0 : index
    %c0_8 = arith.constant 0 : index
    %6 = vector.load %arg4[%c0_7, %c0_8] : memref<128x512xbf16, #tpu.memory_space<vmem>>, vector<128x512xbf16>
    %cst = arith.constant dense<0.000000e+00> : vector<8x512xf32>
    %7 = tpu.matmul %5, %6, %cst {dimension_numbers = #tpu.dot_dimension_numbers<[1], [0], [0], [1], [0, 0, 1, 1], [], []>} : vector<8x128xbf16>, vector<128x512xbf16>, vector<8x512xf32> -> vector<8x512xf32>
    %8 = arith.addf %4, %7 : vector<8x512xf32>
    %c0_9 = arith.constant 0 : index
    %c0_10 = arith.constant 0 : index
    %c0_11 = arith.constant 0 : index
    %9 = vector.load %arg6[%c0_9, %c0_10, %c0_11] : memref<2x1x512xf32, #tpu.memory_space<vmem>>, vector<1x1x512xf32>
    %10 = vector.shape_cast %9 : vector<1x1x512xf32> to vector<1x512xf32>
    %11 = vector.broadcast %10 : vector<1x512xf32> to vector<8x512xf32>
    %12 = arith.addf %8, %11 : vector<8x512xf32>
    %13 = vector.extract_strided_slice %12 {offsets = [0, 0], sizes = [8, 128], strides = [1, 1]} : vector<8x512xf32> to vector<8x128xf32>
    %14 = arith.negf %13 : vector<8x128xf32>
    %15 = math.exp %14 : vector<8x128xf32>
    %cst_12 = arith.constant 1.000000e+00 : f32
    %16 = vector.broadcast %cst_12 : f32 to vector<8x128xf32>
    %17 = arith.addf %16, %15 : vector<8x128xf32>
    %18 = arith.divf %16, %17 : vector<8x128xf32>
    %19 = vector.extract_strided_slice %12 {offsets = [0, 128], sizes = [8, 128], strides = [1, 1]} : vector<8x512xf32> to vector<8x128xf32>
    %20 = arith.negf %19 : vector<8x128xf32>
    %21 = math.exp %20 : vector<8x128xf32>
    %cst_13 = arith.constant 1.000000e+00 : f32
    %22 = vector.broadcast %cst_13 : f32 to vector<8x128xf32>
    %23 = arith.addf %22, %21 : vector<8x128xf32>
    %24 = arith.divf %22, %23 : vector<8x128xf32>
    %25 = vector.extract_strided_slice %12 {offsets = [0, 256], sizes = [8, 128], strides = [1, 1]} : vector<8x512xf32> to vector<8x128xf32>
    %26 = math.tanh %25 : vector<8x128xf32>
    %27 = vector.extract_strided_slice %12 {offsets = [0, 384], sizes = [8, 128], strides = [1, 1]} : vector<8x512xf32> to vector<8x128xf32>
    %28 = arith.negf %27 : vector<8x128xf32>
    %29 = math.exp %28 : vector<8x128xf32>
    %cst_14 = arith.constant 1.000000e+00 : f32
    %30 = vector.broadcast %cst_14 : f32 to vector<8x128xf32>
    %31 = arith.addf %30, %29 : vector<8x128xf32>
    %32 = arith.divf %30, %31 : vector<8x128xf32>
    %33 = arith.mulf %24, %3 : vector<8x128xf32>
    %34 = arith.mulf %18, %26 : vector<8x128xf32>
    %35 = arith.addf %33, %34 : vector<8x128xf32>
    %36 = math.tanh %35 : vector<8x128xf32>
    %37 = arith.mulf %32, %36 : vector<8x128xf32>
    %c0_15 = arith.constant 0 : index
    %c0_16 = arith.constant 0 : index
    %c0_17 = arith.constant 0 : index
    %38 = vector.load %arg10[%c0_15, %c0_16, %c0_17] : memref<2x8x128xf32, #tpu.memory_space<vmem>>, vector<1x8x128xf32>
    %39 = vector.shape_cast %38 : vector<1x8x128xf32> to vector<8x128xf32>
    %40 = vector.shape_cast %37 : vector<8x128xf32> to vector<1x8x128xf32>
    tpu.vector_store %arg10[%c0_15, %c0_16, %c0_17], %40 {strides = array<i32>} : memref<2x8x128xf32, #tpu.memory_space<vmem>>, vector<1x8x128xf32>,
    %c0_18 = arith.constant 0 : index
    %c0_19 = arith.constant 0 : index
    %c0_20 = arith.constant 0 : index
    %41 = vector.load %arg11[%c0_18, %c0_19, %c0_20] : memref<2x8x128xf32, #tpu.memory_space<vmem>>, vector<1x8x128xf32>
    %42 = vector.shape_cast %41 : vector<1x8x128xf32> to vector<8x128xf32>
    %43 = vector.shape_cast %35 : vector<8x128xf32> to vector<1x8x128xf32>
    tpu.vector_store %arg11[%c0_18, %c0_19, %c0_20], %43 {strides = array<i32>} : memref<2x8x128xf32, #tpu.memory_space<vmem>>, vector<1x8x128xf32>,
    %c1 = arith.constant 1 : index
    %c0_21 = arith.constant 0 : index
    %c0_22 = arith.constant 0 : index
    %44 = vector.load %arg2[%c1, %c0_21, %c0_22] : memref<2x8x128xf32, #tpu.memory_space<vmem>>, vector<1x8x128xf32>
    %45 = vector.shape_cast %44 : vector<1x8x128xf32> to vector<8x128xf32>
    %c1_23 = arith.constant 1 : index
    %c0_24 = arith.constant 0 : index
    %c0_25 = arith.constant 0 : index
    %46 = vector.load %arg3[%c1_23, %c0_24, %c0_25] : memref<2x8x128xf32, #tpu.memory_space<vmem>>, vector<1x8x128xf32>
    %47 = vector.shape_cast %46 : vector<1x8x128xf32> to vector<8x128xf32>
    %48 = tpu.concatenate %37, %45 in 1 : vector<8x128xf32>, vector<8x128xf32> -> vector<8x256xf32>
    %49 = arith.truncf %48 : vector<8x256xf32> to vector<8x256xbf16>
    %c0_26 = arith.constant 0 : index
    %c0_27 = arith.constant 0 : index
    %c0_28 = arith.constant 0 : index
    %50 = vector.load %arg5[%c0_26, %c0_27, %c0_28] : memref<1x256x512xbf16, #tpu.memory_space<vmem>>, vector<1x256x512xbf16>
    %51 = vector.shape_cast %50 : vector<1x256x512xbf16> to vector<256x512xbf16>
    %cst_29 = arith.constant dense<0.000000e+00> : vector<8x512xf32>
    %52 = tpu.matmul %49, %51, %cst_29 {dimension_numbers = #tpu.dot_dimension_numbers<[1], [0], [0], [1], [0, 0, 1, 1], [], []>} : vector<8x256xbf16>, vector<256x512xbf16>, vector<8x512xf32> -> vector<8x512xf32>
    %c1_30 = arith.constant 1 : index
    %c0_31 = arith.constant 0 : index
    %c0_32 = arith.constant 0 : index
    %53 = vector.load %arg6[%c1_30, %c0_31, %c0_32] : memref<2x1x512xf32, #tpu.memory_space<vmem>>, vector<1x1x512xf32>
    %54 = vector.shape_cast %53 : vector<1x1x512xf32> to vector<1x512xf32>
    %55 = vector.broadcast %54 : vector<1x512xf32> to vector<8x512xf32>
    %56 = arith.addf %52, %55 : vector<8x512xf32>
    %57 = vector.extract_strided_slice %56 {offsets = [0, 0], sizes = [8, 128], strides = [1, 1]} : vector<8x512xf32> to vector<8x128xf32>
    %58 = arith.negf %57 : vector<8x128xf32>
    %59 = math.exp %58 : vector<8x128xf32>
    %cst_33 = arith.constant 1.000000e+00 : f32
    %60 = vector.broadcast %cst_33 : f32 to vector<8x128xf32>
    %61 = arith.addf %60, %59 : vector<8x128xf32>
    %62 = arith.divf %60, %61 : vector<8x128xf32>
    %63 = vector.extract_strided_slice %56 {offsets = [0, 128], sizes = [8, 128], strides = [1, 1]} : vector<8x512xf32> to vector<8x128xf32>
    %64 = arith.negf %63 : vector<8x128xf32>
    %65 = math.exp %64 : vector<8x128xf32>
    %cst_34 = arith.constant 1.000000e+00 : f32
    %66 = vector.broadcast %cst_34 : f32 to vector<8x128xf32>
    %67 = arith.addf %66, %65 : vector<8x128xf32>
    %68 = arith.divf %66, %67 : vector<8x128xf32>
    %69 = vector.extract_strided_slice %56 {offsets = [0, 256], sizes = [8, 128], strides = [1, 1]} : vector<8x512xf32> to vector<8x128xf32>
    %70 = math.tanh %69 : vector<8x128xf32>
    %71 = vector.extract_strided_slice %56 {offsets = [0, 384], sizes = [8, 128], strides = [1, 1]} : vector<8x512xf32> to vector<8x128xf32>
    %72 = arith.negf %71 : vector<8x128xf32>
    %73 = math.exp %72 : vector<8x128xf32>
    %cst_35 = arith.constant 1.000000e+00 : f32
    %74 = vector.broadcast %cst_35 : f32 to vector<8x128xf32>
    %75 = arith.addf %74, %73 : vector<8x128xf32>
    %76 = arith.divf %74, %75 : vector<8x128xf32>
    %77 = arith.mulf %68, %47 : vector<8x128xf32>
    %78 = arith.mulf %62, %70 : vector<8x128xf32>
    %79 = arith.addf %77, %78 : vector<8x128xf32>
    %80 = math.tanh %79 : vector<8x128xf32>
    %81 = arith.mulf %76, %80 : vector<8x128xf32>
    %c1_36 = arith.constant 1 : index
    %c0_37 = arith.constant 0 : index
    %c0_38 = arith.constant 0 : index
    %82 = vector.load %arg10[%c1_36, %c0_37, %c0_38] : memref<2x8x128xf32, #tpu.memory_space<vmem>>, vector<1x8x128xf32>
    %83 = vector.shape_cast %82 : vector<1x8x128xf32> to vector<8x128xf32>
    %84 = vector.shape_cast %81 : vector<8x128xf32> to vector<1x8x128xf32>
    tpu.vector_store %arg10[%c1_36, %c0_37, %c0_38], %84 {strides = array<i32>} : memref<2x8x128xf32, #tpu.memory_space<vmem>>, vector<1x8x128xf32>,
    %c1_39 = arith.constant 1 : index
    %c0_40 = arith.constant 0 : index
    %c0_41 = arith.constant 0 : index
    %85 = vector.load %arg11[%c1_39, %c0_40, %c0_41] : memref<2x8x128xf32, #tpu.memory_space<vmem>>, vector<1x8x128xf32>
    %86 = vector.shape_cast %85 : vector<1x8x128xf32> to vector<8x128xf32>
    %87 = vector.shape_cast %79 : vector<8x128xf32> to vector<1x8x128xf32>
    tpu.vector_store %arg11[%c1_39, %c0_40, %c0_41], %87 {strides = array<i32>} : memref<2x8x128xf32, #tpu.memory_space<vmem>>, vector<1x8x128xf32>,
    %88 = arith.truncf %81 : vector<8x128xf32> to vector<8x128xbf16>
    %c0_42 = arith.constant 0 : index
    %c0_43 = arith.constant 0 : index
    %89 = vector.load %arg7[%c0_42, %c0_43] : memref<128x256xbf16, #tpu.memory_space<vmem>>, vector<128x256xbf16>
    %cst_44 = arith.constant dense<0.000000e+00> : vector<8x256xf32>
    %90 = tpu.matmul %88, %89, %cst_44 {dimension_numbers = #tpu.dot_dimension_numbers<[1], [0], [0], [1], [0, 0, 1, 1], [], []>} : vector<8x128xbf16>, vector<128x256xbf16>, vector<8x256xf32> -> vector<8x256xf32>
    %c0_45 = arith.constant 0 : index
    %c0_46 = arith.constant 0 : index
    %91 = vector.load %arg8[%c0_45, %c0_46] : memref<1x256xf32, #tpu.memory_space<vmem>>, vector<1x256xf32>
    %92 = vector.broadcast %91 : vector<1x256xf32> to vector<8x256xf32>
    %93 = arith.addf %90, %92 : vector<8x256xf32>
    %cst_47 = arith.constant dense<0xFF800000> : vector<8xf32>
    %94 = vector.multi_reduction <maximumf>, %93, %cst_47 [1] : vector<8x256xf32> to vector<8xf32>
    %95 = vector.shape_cast %94 : vector<8xf32> to vector<8x1xf32>
    %96 = vector.broadcast %95 : vector<8x1xf32> to vector<8x256xf32>
    %97 = arith.subf %93, %96 : vector<8x256xf32>
    %98 = math.exp %97 : vector<8x256xf32>
    %cst_48 = arith.constant dense<0.000000e+00> : vector<8xf32>
    %99 = vector.multi_reduction <add>, %98, %cst_48 [1] : vector<8x256xf32> to vector<8xf32>
    %100 = vector.shape_cast %99 : vector<8xf32> to vector<8x1xf32>
    %101 = math.log %100 : vector<8x1xf32>
    %102 = vector.broadcast %101 : vector<8x1xf32> to vector<8x256xf32>
    %103 = arith.subf %97, %102 : vector<8x256xf32>
    %c0_49 = arith.constant 0 : index
    %c0_50 = arith.constant 0 : index
    %104 = vector.load %arg9[%c0_49, %c0_50] : memref<8x256xf32, #tpu.memory_space<vmem>>, vector<8x256xf32>
    tpu.vector_store %arg9[%c0_49, %c0_50], %103 {strides = array<i32>} : memref<8x256xf32, #tpu.memory_space<vmem>>, vector<8x256xf32>,
    return
  }
  func.func @transform_0(%arg0: i32) -> (i32, i32) {
    %c0_i32 = arith.constant 0 : i32
    %c0_i32_0 = arith.constant 0 : i32
    %c0_i32_1 = arith.constant 0 : i32
    return %c0_i32, %c0_i32_0 : i32, i32
  }
  func.func @transform_1(%arg0: i32) -> (i32, i32, i32) {
    %c0_i32 = arith.constant 0 : i32
    %c0_i32_0 = arith.constant 0 : i32
    %c0_i32_1 = arith.constant 0 : i32
    %c0_i32_2 = arith.constant 0 : i32
    return %c0_i32, %c0_i32_0, %c0_i32_1 : i32, i32, i32
  }
  func.func @transform_2(%arg0: i32) -> (i32, i32, i32) {
    %c0_i32 = arith.constant 0 : i32
    %c0_i32_0 = arith.constant 0 : i32
    %c0_i32_1 = arith.constant 0 : i32
    %c0_i32_2 = arith.constant 0 : i32
    return %c0_i32, %c0_i32_0, %c0_i32_1 : i32, i32, i32
  }
  func.func @transform_3(%arg0: i32) -> (i32, i32) {
    %c0_i32 = arith.constant 0 : i32
    %c0_i32_0 = arith.constant 0 : i32
    %c0_i32_1 = arith.constant 0 : i32
    return %c0_i32, %c0_i32_0 : i32, i32
  }
  func.func @transform_4(%arg0: i32) -> (i32, i32, i32) {
    %c0_i32 = arith.constant 0 : i32
    %c0_i32_0 = arith.constant 0 : i32
    %c0_i32_1 = arith.constant 0 : i32
    %c0_i32_2 = arith.constant 0 : i32
    return %c0_i32, %c0_i32_0, %c0_i32_1 : i32, i32, i32
  }
  func.func @transform_5(%arg0: i32) -> (i32, i32, i32) {
    %c0_i32 = arith.constant 0 : i32
    %c0_i32_0 = arith.constant 0 : i32
    %c0_i32_1 = arith.constant 0 : i32
    %c0_i32_2 = arith.constant 0 : i32
    return %c0_i32, %c0_i32_0, %c0_i32_1 : i32, i32, i32
  }
  func.func @transform_6(%arg0: i32) -> (i32, i32) {
    %c0_i32 = arith.constant 0 : i32
    %c0_i32_0 = arith.constant 0 : i32
    %c0_i32_1 = arith.constant 0 : i32
    return %c0_i32, %c0_i32_0 : i32, i32
  }
  func.func @transform_7(%arg0: i32) -> (i32, i32) {
    %c0_i32 = arith.constant 0 : i32
    %c0_i32_0 = arith.constant 0 : i32
    %c0_i32_1 = arith.constant 0 : i32
    return %c0_i32, %c0_i32_0 : i32, i32
  }
  func.func @transform_8(%arg0: i32) -> (i32, i32) {
    %c0_i32 = arith.constant 0 : i32
    %c0_i32_0 = arith.constant 0 : i32
    %c0_i32_1 = arith.constant 0 : i32
    return %c0_i32, %c0_i32_0 : i32, i32
  }
  func.func @transform_9(%arg0: i32) -> (i32, i32, i32) {
    %c0_i32 = arith.constant 0 : i32
    %c0_i32_0 = arith.constant 0 : i32
    %c0_i32_1 = arith.constant 0 : i32
    %c0_i32_2 = arith.constant 0 : i32
    return %c0_i32, %c0_i32_0, %c0_i32_1 : i32, i32, i32
  }
  func.func @transform_10(%arg0: i32) -> (i32, i32, i32) {
    %c0_i32 = arith.constant 0 : i32
    %c0_i32_0 = arith.constant 0 : i32
    %c0_i32_1 = arith.constant 0 : i32
    %c0_i32_2 = arith.constant 0 : i32
    return %c0_i32, %c0_i32_0, %c0_i32_1 : i32, i32, i32
  }
}

</mosaic_0001>

<bundles_post_ra>
// kernel: decoder_forward.1
= control target key start
LH: loop header
LB: loop body
LE: loop exit
PB: predicated region body
PF: predicated region fallthrough
CT: control target
= control target key end

     0   :  { %16 = vsyncpa [#allocation3], 0  ;;  %s1976_s0 = inlined_call_operand.vmem [shape: f32[8,512], index: 0, kind: input, shape index: {}]   ;;  %s1977_s1 = inlined_call_operand.hbm [shape: f32[2,8,128], index: 1, kind: input, shape index: {}, may-alias: {1,9}]   ;;  %s1978_s2 = inlined_call_operand.hbm [shape: f32[2,8,128], index: 2, kind: input, shape index: {}, may-alias: {2,10}]   ;;  %s1979_s3 = inlined_call_operand.vmem [shape: bf16[128,512], index: 3, kind: input, shape index: {}]   ;;  %s1980_s4 = inlined_call_operand.hbm [shape: bf16[1,256,512], index: 4, kind: input, shape index: {}]   ;;  %s1981_s5 = inlined_call_operand.vmem [shape: f32[2,1,512], index: 5, kind: input, shape index: {}]   ;;  %s1982_s6 = inlined_call_operand.vmem [shape: bf16[128,256], index: 6, kind: input, shape index: {}]   ;;  %s1983_s7 = inlined_call_operand.vmem [shape: f32[1,256], index: 7, kind: input, shape index: {}]   ;;  %s1984_s8 = inlined_call_operand.hbm [shape: f32[8,256], index: 8, kind: output, shape index: {0}]   ;;  %s1985_s9 = inlined_call_operand.hbm [shape: f32[2,8,128], index: 9, kind: output, shape index: {1}, may-alias: {1,9}]   ;;  %s1986_s10 = inlined_call_operand.hbm [shape: f32[2,8,128], index: 10, kind: output, shape index: {2}, may-alias: {2,10}]  }
   0x1   :  { %17 = vsyncpa [#allocation6], 0 }
   0x2   :  { %18 = vsyncpa [#allocation4], 0 }
   0x3   :  { %19 = vsyncpa [#allocation10], 0  ;;  %s1627_s13 = smov [#allocation5]   ;;  %s1628_s15 = smov [#allocation2]  }
   0x4   :  { %s39_s14 = sshll.u32 %s1627_s13, 4  ;;  %s27_s16 = sshll.u32 %s1628_s15, 4  ;;  %s40_s14 = int_to_ptr.vmem [resolvable:$true] %s39_s14  ;;  %s1693_s16 = int_to_ptr.vmem [resolvable:$true] %s27_s16 }
   0x5   :  { %s1487_s19 = scalar_lea.hbm %s1978_s2, 256 }
   0x6   :  { %p1488_p0 = scmp.ne.s32.totalorder %s1978_s2, %s1487_s19  ;;  %p1491_p1 = scmp.lt.u32.totalorder %s1487_s19, %s1978_s2 }
   0x8   :  { %p1493_p2 = pnand %p1491_p1, %p1488_p0 }
   0xa   :  { %1496 = shalt.err (!%p1493_p2)
}
   0xb   :  { %s1497_s24 = scalar_lea.vmem %s40_s14, 256  ;;  %p1502_p4 = scmp.lt.s32.totalorder %s40_s14, %s40_s14 }
   0xc   :  { %p1498_p3 = scmp.ne.s32.totalorder %s40_s14, %s1497_s24  ;;  %p1503_p5 = scmp.lt.s32.totalorder %s1497_s24, %s1497_s24 }
   0xe   :  { %p1504_p6 = por %p1503_p5, %p1502_p4 }
  0x10   :  { %p1505_p7 = pnand %p1504_p6, %p1498_p3 }
  0x12   :  { %1508 = shalt.err (!%p1505_p7)
}
  0x13   :  { %s1629_s25 = smov 128   ;;  %s1630_s26 = smov 8  }
  0x14   :  { %45 = dma.hbm_to_vmem [thread:$0]  %s1978_s2, 256, %s40_s14, [#allocation6], %s1629_s25, %s1629_s25, %s1630_s26  }
  0x15   :  { %s1509_s11 = scalar_lea.hbm %s1977_s1, 256 }
  0x16   :  { %p1510_p8 = scmp.ne.s32.totalorder %s1977_s1, %s1509_s11  ;;  %p1513_p9 = scmp.lt.u32.totalorder %s1509_s11, %s1977_s1 }
  0x18   :  { %p1515_p10 = pnand %p1513_p9, %p1510_p8 }
  0x1a   :  { %1518 = shalt.err (!%p1515_p10)
}
  0x1b   :  { %s1519_s18 = scalar_lea.vmem %s1693_s16, 256  ;;  %p1524_p12 = scmp.lt.s32.totalorder %s1693_s16, %s1693_s16 }
  0x1c   :  { %p1520_p11 = scmp.ne.s32.totalorder %s1693_s16, %s1519_s18  ;;  %p1525_p13 = scmp.lt.s32.totalorder %s1519_s18, %s1519_s18 }
  0x1e   :  { %p1526_p0 = por %p1525_p13, %p1524_p12 }
  0x20   :  { %p1527_p1 = pnand %p1526_p0, %p1520_p11 }
  0x22   :  { %1530 = shalt.err (!%p1527_p1)
}
  0x23   :  { %33 = dma.hbm_to_vmem [thread:$0]  %s1977_s1, 256, %s1693_s16, [#allocation3], %s1629_s25, %s1629_s25, %s1630_s26  }
  0x24   :  { %s1631_s19 = smov [#allocation7]   ;;  %s1531_s23 = scalar_lea.hbm %s1980_s4, 8192 }
  0x25   :  { %s53_s20 = sshll.u32 %s1631_s19, 4  ;;  %p1532_p2 = scmp.ne.s32.totalorder %s1980_s4, %s1531_s23  ;;  %s54_s20 = int_to_ptr.vmem [resolvable:$true] %s53_s20 }
  0x26   :  { %p1535_p3 = scmp.lt.u32.totalorder %s1531_s23, %s1980_s4 }
  0x28   :  { %p1537_p4 = pnand %p1535_p3, %p1532_p2 }
  0x2a   :  { %1540 = shalt.err (!%p1537_p4)
}
  0x2b   :  { %s1541_s30 = scalar_lea.vmem %s54_s20, 8192  ;;  %p1546_p6 = scmp.lt.s32.totalorder %s54_s20, %s54_s20 }
  0x2c   :  { %p1542_p5 = scmp.ne.s32.totalorder %s54_s20, %s1541_s30  ;;  %p1547_p7 = scmp.lt.s32.totalorder %s1541_s30, %s1541_s30 }
  0x2e   :  { %p1548_p8 = por %p1547_p7, %p1546_p6 }
  0x30   :  { %p1549_p9 = pnand %p1548_p8, %p1542_p5 }
  0x32   :  { %1552 = shalt.err (!%p1549_p9)
}
  0x33   :  { %s1632_s1 = smov 256   ;;  %s1633_s16 = smov 16  }
  0x34   :  { %59 = dma.hbm_to_vmem [thread:$0]  %s1980_s4, 8192, %s54_s20, [#allocation6], %s1632_s1, %s1632_s1, %s1633_s16  }
  0x35   :  { %1619 = dma.done.wait [#allocation3], 256  }
  0x36   :  { %1620 = vsyncadd [#allocation3], 4294967040 }
  0x37   :  { %1621 = dma.done.wait [#allocation6], 8448  }
  0x38   :  { %1622 = vsyncadd [#allocation6], 4294958848  ;;  %v1634_v0 = vmov 0   ;;  %v1281_v1 = vld [vmem:[%s1979_s3 + $0x4] ss:$16 sps:$4 sm:$0xff]  }
  0x39   :  { %307 = vmatprep.mubr.bf16.mxu0 %v1634_v0  ;;  %348 = vmatprep.mubr.bf16.mxu1 %v1634_v0  ;;  %v1283_v2 = vld [vmem:[%s1979_s3] ss:$16 sps:$4 sm:$0xff]   ;;  %v1284_v3 = vld [vmem:[%s1979_s3 + $0x24] ss:$16 sps:$4 sm:$0xff]   ;;  %v1292_v6 = vld [vmem:[%s1979_s3 + $0xc] ss:$16 sps:$4 sm:$0xff]  }
  0x3a   :  { %275 = vmatprep.subr.bf16.mxu0 %v1281_v1  ;;  %v1286_v4 = vld [vmem:[%s1979_s3 + $0x20] ss:$16 sps:$4 sm:$0xff]   ;;  %v1287_v5 = vld [vmem:[%s1979_s3 + $0x44] ss:$16 sps:$4 sm:$0xff]   ;;  %v1295_v7 = vld [vmem:[%s1979_s3 + $0x8] ss:$16 sps:$4 sm:$0xff]   ;;  %316 = vmatprep.subr.bf16.mxu1 %v1292_v6 }
  0x3b   :  { %276 = vmatpush1.bf16.msra.mxu0 %v1283_v2  ;;  %v1289_v8 = vld [vmem:[%s1979_s3 + $0x40] ss:$16 sps:$4 sm:$0xff]   ;;  %v1290_v9 = vld [vmem:[%s1979_s3 + $0x64] ss:$16 sps:$4 sm:$0xff]   ;;  %317 = vmatpush1.bf16.msra.mxu1 %v1295_v7  ;;  %v1298_v10 = vld [vmem:[%s1979_s3 + $0x2c] ss:$16 sps:$4 sm:$0xff]  }
  0x3c   :  { %277 = vmatprep.subr.bf16.mxu0 %v1284_v3  ;;  %v1301_v11 = vld [vmem:[%s1979_s3 + $0x28] ss:$16 sps:$4 sm:$0xff]   ;;  %318 = vmatprep.subr.bf16.mxu1 %v1298_v10  ;;  %v1294_v12 = vld [vmem:[%s1979_s3 + $0x60] ss:$16 sps:$4 sm:$0xff]   ;;  %v1296_v13 = vld [vmem:[%s1979_s3 + $0x84] ss:$16 sps:$4 sm:$0xff]  }
  0x3d   :  { %v1304_v14 = vld [vmem:[%s1979_s3 + $0x4c] ss:$16 sps:$4 sm:$0xff]   ;;  %v1307_v15 = vld [vmem:[%s1979_s3 + $0x48] ss:$16 sps:$4 sm:$0xff]   ;;  %v1300_v17 = vld [vmem:[%s1979_s3 + $0x80] ss:$16 sps:$4 sm:$0xff]  }
  0x3e   :  { %v1310_v16 = vld [vmem:[%s1979_s3 + $0x6c] ss:$16 sps:$4 sm:$0xff]   ;;  %v1302_v18 = vld [vmem:[%s1979_s3 + $0xa4] ss:$16 sps:$4 sm:$0xff]   ;;  %v1313_v19 = vld [vmem:[%s1979_s3 + $0x68] ss:$16 sps:$4 sm:$0xff]  }
  0x3f   :  { %278 = vmatpush1.bf16.msra.mxu0 %v1286_v4  ;;  %319 = vmatpush1.bf16.msra.mxu1 %v1301_v11  ;;  %v1316_v20 = vld [vmem:[%s1979_s3 + $0x8c] ss:$16 sps:$4 sm:$0xff]   ;;  %v1306_v21 = vld [vmem:[%s1979_s3 + $0xa0] ss:$16 sps:$4 sm:$0xff]   ;;  %v1308_v22 = vld [vmem:[%s1979_s3 + $0xc4] ss:$16 sps:$4 sm:$0xff]  }
  0x40   :  { %279 = vmatprep.subr.bf16.mxu0 %v1287_v5  ;;  %320 = vmatprep.subr.bf16.mxu1 %v1304_v14  ;;  %v1319_v23 = vld [vmem:[%s1979_s3 + $0x88] ss:$16 sps:$4 sm:$0xff]   ;;  %v1320_v24 = vld [vmem:[%s1979_s3 + $0xac] ss:$16 sps:$4 sm:$0xff]   ;;  %v1312_v25 = vld [vmem:[%s1979_s3 + $0xc0] ss:$16 sps:$4 sm:$0xff]  }
  0x41   :  { %v1314_v26 = vld [vmem:[%s1979_s3 + $0xe4] ss:$16 sps:$4 sm:$0xff]   ;;  %v1322_v27 = vld [vmem:[%s1979_s3 + $0xa8] ss:$16 sps:$4 sm:$0xff]   ;;  %v1323_v28 = vld [vmem:[%s1979_s3 + $0xcc] ss:$16 sps:$4 sm:$0xff]  }
  0x42   :  { %v1318_v29 = vld [vmem:[%s1979_s3 + $0xe0] ss:$16 sps:$4 sm:$0xff]   ;;  %v1325_v31 = vld [vmem:[%s1979_s3 + $0xc8] ss:$16 sps:$4 sm:$0xff]   ;;  %v1331_v32 = vld [vmem:[#allocation7 + $0x4] ss:$16 sps:$4 sm:$0xff]  }
  0x43   :  { %280 = vmatpush1.bf16.msra.mxu0 %v1289_v8  ;;  %321 = vmatpush1.bf16.msra.mxu1 %v1307_v15  ;;  %v76_v30 = vld [vmem:[#allocation2] sm:$0xff]  ;;  %v1326_v33 = vld [vmem:[%s1979_s3 + $0xec] ss:$16 sps:$4 sm:$0xff]   ;;  %v1328_v35 = vld [vmem:[%s1979_s3 + $0xe8] ss:$16 sps:$4 sm:$0xff]  }
  0x44   :  { %281 = vmatprep.subr.bf16.mxu0 %v1290_v9  ;;  %322 = vmatprep.subr.bf16.mxu1 %v1310_v16  ;;  %v82_v34 = vpack.c.bf16 %v76_v30, %v76_v30  ;;  %v1329_v36 = vld [vmem:[#allocation7] ss:$16 sps:$4 sm:$0xff]   ;;  %v1334_v37 = vld [vmem:[#allocation7 + $0xc] ss:$16 sps:$4 sm:$0xff]   ;;  %v1337_v38 = vld [vmem:[#allocation7 + $0x24] ss:$16 sps:$4 sm:$0xff]  }
  0x45   :  { %v1335_v39 = vld [vmem:[#allocation7 + $0x20] ss:$16 sps:$4 sm:$0xff]   ;;  %v1332_v40 = vld [vmem:[#allocation7 + $0x8] ss:$16 sps:$4 sm:$0xff]   ;;  %v1343_v41 = vld [vmem:[#allocation7 + $0x44] ss:$16 sps:$4 sm:$0xff]  }
  0x46   :  { %v1340_v42 = vld [vmem:[#allocation7 + $0x2c] ss:$16 sps:$4 sm:$0xff]   ;;  %v1341_v43 = vld [vmem:[#allocation7 + $0x40] ss:$16 sps:$4 sm:$0xff]   ;;  %v1338_v44 = vld [vmem:[#allocation7 + $0x28] ss:$16 sps:$4 sm:$0xff]  }
  0x47   :  { %282 = vmatpush1.bf16.msra.mxu0 %v1294_v12  ;;  %323 = vmatpush1.bf16.msra.mxu1 %v1313_v19  ;;  %v1349_v45 = vld [vmem:[#allocation7 + $0x64] ss:$16 sps:$4 sm:$0xff]   ;;  %v1346_v46 = vld [vmem:[#allocation7 + $0x4c] ss:$16 sps:$4 sm:$0xff]   ;;  %v1347_v47 = vld [vmem:[#allocation7 + $0x60] ss:$16 sps:$4 sm:$0xff]  }
  0x48   :  { %283 = vmatprep.subr.bf16.mxu0 %v1296_v13  ;;  %324 = vmatprep.subr.bf16.mxu1 %v1316_v20  ;;  %v1344_v48 = vld [vmem:[#allocation7 + $0x48] ss:$16 sps:$4 sm:$0xff]   ;;  %v1352_v49 = vld [vmem:[#allocation7 + $0x6c] ss:$16 sps:$4 sm:$0xff]   ;;  %v1355_v51 = vld [vmem:[#allocation7 + $0x84] ss:$16 sps:$4 sm:$0xff]  }
  0x49   :  { %v1350_v50 = vld [vmem:[#allocation7 + $0x68] ss:$16 sps:$4 sm:$0xff]   ;;  %v1358_v52 = vld [vmem:[#allocation7 + $0x8c] ss:$16 sps:$4 sm:$0xff]   ;;  %v1353_v53 = vld [vmem:[#allocation7 + $0x80] ss:$16 sps:$4 sm:$0xff]  }
  0x4a   :  { %v1356_v54 = vld [vmem:[#allocation7 + $0x88] ss:$16 sps:$4 sm:$0xff]   ;;  %v1361_v55 = vld [vmem:[#allocation7 + $0xa4] ss:$16 sps:$4 sm:$0xff]   ;;  %v1364_v56 = vld [vmem:[#allocation7 + $0xac] ss:$16 sps:$4 sm:$0xff]  }
  0x4b   :  { %284 = vmatpush1.bf16.msra.mxu0 %v1300_v17  ;;  %325 = vmatpush1.bf16.msra.mxu1 %v1319_v23  ;;  %v1359_v57 = vld [vmem:[#allocation7 + $0xa0] ss:$16 sps:$4 sm:$0xff]   ;;  %v1362_v58 = vld [vmem:[#allocation7 + $0xa8] ss:$16 sps:$4 sm:$0xff]   ;;  %v1367_v59 = vld [vmem:[#allocation7 + $0xc4] ss:$16 sps:$4 sm:$0xff]  }
  0x4c   :  { %285 = vmatprep.subr.bf16.mxu0 %v1302_v18  ;;  %326 = vmatprep.subr.bf16.mxu1 %v1320_v24  ;;  %v1370_v60 = vld [vmem:[#allocation7 + $0xcc] ss:$16 sps:$4 sm:$0xff]   ;;  %v1365_v61 = vld [vmem:[#allocation7 + $0xc0] ss:$16 sps:$4 sm:$0xff]   ;;  %v1368_v62 = vld [vmem:[#allocation7 + $0xc8] ss:$16 sps:$4 sm:$0xff]  }
  0x4d   :  { %v1373_v63 = vld [vmem:[#allocation7 + $0xe4] ss:$16 sps:$4 sm:$0xff]   ;;  %v1376_v1 = vld [vmem:[#allocation7 + $0xec] ss:$16 sps:$4 sm:$0xff]   ;;  %v1371_v2 = vld [vmem:[#allocation7 + $0xe0] ss:$16 sps:$4 sm:$0xff]  }
  0x4e   :  { %v1374_v3 = vld [vmem:[#allocation7 + $0xe8] ss:$16 sps:$4 sm:$0xff]   ;;  %v1379_v4 = vld [vmem:[#allocation7 + $0x104] ss:$16 sps:$4 sm:$0xff]   ;;  %v1382_v5 = vld [vmem:[#allocation7 + $0x10c] ss:$16 sps:$4 sm:$0xff]  }
  0x4f   :  { %286 = vmatpush1.bf16.msra.mxu0 %v1306_v21  ;;  %327 = vmatpush1.bf16.msra.mxu1 %v1322_v27  ;;  %v1377_v6 = vld [vmem:[#allocation7 + $0x100] ss:$16 sps:$4 sm:$0xff]   ;;  %v1380_v7 = vld [vmem:[#allocation7 + $0x108] ss:$16 sps:$4 sm:$0xff]   ;;  %v1385_v8 = vld [vmem:[#allocation7 + $0x124] ss:$16 sps:$4 sm:$0xff]  }
  0x50   :  { %287 = vmatprep.subr.bf16.mxu0 %v1308_v22  ;;  %328 = vmatprep.subr.bf16.mxu1 %v1323_v28  ;;  %v1388_v9 = vld [vmem:[#allocation7 + $0x12c] ss:$16 sps:$4 sm:$0xff]   ;;  %v1383_v10 = vld [vmem:[#allocation7 + $0x120] ss:$16 sps:$4 sm:$0xff]   ;;  %v1386_v11 = vld [vmem:[#allocation7 + $0x128] ss:$16 sps:$4 sm:$0xff]  }
  0x51   :  { %v1391_v12 = vld [vmem:[#allocation7 + $0x144] ss:$16 sps:$4 sm:$0xff]   ;;  %v1394_v13 = vld [vmem:[#allocation7 + $0x14c] ss:$16 sps:$4 sm:$0xff]   ;;  %v1389_v14 = vld [vmem:[#allocation7 + $0x140] ss:$16 sps:$4 sm:$0xff]  }
  0x52   :  { %v1392_v15 = vld [vmem:[#allocation7 + $0x148] ss:$16 sps:$4 sm:$0xff]   ;;  %v1397_v16 = vld [vmem:[#allocation7 + $0x164] ss:$16 sps:$4 sm:$0xff]   ;;  %v1400_v17 = vld [vmem:[#allocation7 + $0x16c] ss:$16 sps:$4 sm:$0xff]  }
  0x53   :  { %288 = vmatpush1.bf16.msra.mxu0 %v1312_v25  ;;  %329 = vmatpush1.bf16.msra.mxu1 %v1325_v31  ;;  %v1395_v18 = vld [vmem:[#allocation7 + $0x160] ss:$16 sps:$4 sm:$0xff]   ;;  %v1398_v19 = vld [vmem:[#allocation7 + $0x168] ss:$16 sps:$4 sm:$0xff]   ;;  %v1403_v20 = vld [vmem:[#allocation7 + $0x184] ss:$16 sps:$4 sm:$0xff]  }
  0x54   :  { %289 = vmatprep.subr.bf16.mxu0 %v1314_v26  ;;  %330 = vmatprep.subr.bf16.mxu1 %v1326_v33  ;;  %v1406_v21 = vld [vmem:[#allocation7 + $0x18c] ss:$16 sps:$4 sm:$0xff]   ;;  %v1401_v22 = vld [vmem:[#allocation7 + $0x180] ss:$16 sps:$4 sm:$0xff]   ;;  %v1404_v23 = vld [vmem:[#allocation7 + $0x188] ss:$16 sps:$4 sm:$0xff]  }
  0x55   :  { %v1407_v24 = vld [vmem:[#allocation7 + $0x1a0] ss:$16 sps:$4 sm:$0xff]   ;;  %v1409_v25 = vld [vmem:[#allocation7 + $0x1a4] ss:$16 sps:$4 sm:$0xff]   ;;  %v1410_v26 = vld [vmem:[#allocation7 + $0x1a8] ss:$16 sps:$4 sm:$0xff]  }
  0x56   :  { %v1412_v27 = vld [vmem:[#allocation7 + $0x1ac] ss:$16 sps:$4 sm:$0xff]   ;;  %v1415_v28 = vld [vmem:[#allocation7 + $0x1c4] ss:$16 sps:$4 sm:$0xff]   ;;  %v1413_v30 = vld [vmem:[#allocation7 + $0x1c0] ss:$16 sps:$4 sm:$0xff]  }
  0x57   :  { %290 = vmatpush1.bf16.msra.mxu0 %v1318_v29  ;;  %331 = vmatpush1.bf16.msra.mxu1 %v1328_v35  ;;  %v1418_v29 = vld [vmem:[#allocation7 + $0x1cc] ss:$16 sps:$4 sm:$0xff]   ;;  %v1416_v31 = vld [vmem:[#allocation7 + $0x1c8] ss:$16 sps:$4 sm:$0xff]   ;;  %v1421_v33 = vld [vmem:[#allocation7 + $0x1e4] ss:$16 sps:$4 sm:$0xff]  }
  0x58   :  { %826 = vmatprep.subr.bf16.mxu0 %v1331_v32  ;;  %867 = vmatprep.subr.bf16.mxu1 %v1334_v37  ;;  %v414_v32 = vld [vmem:[#allocation2 + $0x8] sm:$0xff] }
  0x59   :  { %v418_v35 = vpack.c.bf16 %v414_v32, %v414_v32  ;;  %v1422_v37 = vld [vmem:[#allocation7 + $0x1e8] ss:$16 sps:$4 sm:$0xff]  }
  0x5a   :  { %308 = vmatmul.mubr.bf16.vlgmr.msra.gmra.mrb[0].mxu0 %v82_v34  ;;  %349 = vmatmul.mubr.bf16.vlgmr.msra.gmra.mrb[0].mxu1 %v82_v34  ;;  %v1424_v34 = vld [vmem:[#allocation7 + $0x1ec] ss:$16 sps:$4 sm:$0xff]   ;;  %v1434_v32 = vld [vmem:[%s1982_s6 + $0x30] ss:$8 sps:$4 sm:$0xff]  }
  0x5b   :  { %827 = vmatpush1.bf16.msra.mxu0 %v1329_v36  ;;  %868 = vmatpush1.bf16.msra.mxu1 %v1332_v40  ;;  %v1419_v36 = vld [vmem:[#allocation7 + $0x1e0] ss:$16 sps:$4 sm:$0xff]  }
  0x5c   :  { %828 = vmatprep.subr.bf16.mxu0 %v1337_v38  ;;  %869 = vmatprep.subr.bf16.mxu1 %v1340_v42  ;;  %v363_v38 = vlaneseq }
  0x5d   :  { %858 = vmatprep.mubr.bf16.mxu0 %v418_v35  ;;  %899 = vmatprep.mubr.bf16.mxu1 %v418_v35  ;;  %v1442_v35 = vld [vmem:[%s1982_s6 + $0x54] ss:$8 sps:$4 sm:$0xff]  }
  0x5f   :  { %829 = vmatpush1.bf16.msra.mxu0 %v1335_v39  ;;  %870 = vmatpush1.bf16.msra.mxu1 %v1338_v44  ;;  %v1840_v39 = vshrl.u32 %v363_v38, 7  ;;  %v1443_v38 = vld [vmem:[%s1982_s6 + $0x60] ss:$8 sps:$4 sm:$0xff]  }
  0x60   :  { %830 = vmatprep.subr.bf16.mxu0 %v1343_v41  ;;  %871 = vmatprep.subr.bf16.mxu1 %v1346_v46  ;;  %v361_v41 = vld [vmem:[%s1981_s5] sm:$0xf] }
  0x61   :  { %v1843_v40 = vsub.s32 0, %v1840_v39  ;;  %v1849_v42 = vsub.s32 1, %v1840_v39 }
  0x63   :  { %831 = vmatpush1.bf16.msra.mxu0 %v1341_v43  ;;  %872 = vmatpush1.bf16.msra.mxu1 %v1344_v48  ;;  %v78_v43 = vld [vmem:[%s1976_s0] sm:$0xff]  ;;  %v366_v44 = vrot.slane %v361_v41, %v1843_v40 }
  0x64   :  { %832 = vmatprep.subr.bf16.mxu0 %v1349_v45  ;;  %873 = vmatprep.subr.bf16.mxu1 %v1352_v49  ;;  %v79_v45 = vld [vmem:[%s1976_s0 + $0x8] sm:$0xff] }
  0x67   :  { %833 = vmatpush1.bf16.msra.mxu0 %v1347_v47  ;;  %874 = vmatpush1.bf16.msra.mxu1 %v1350_v50  ;;  %v370_v47 = vrot.slane %v361_v41, %v1849_v42  ;;  %v377_v50 = vsub.s32 3, %v1840_v39 }
  0x68   :  { %834 = vmatprep.subr.bf16.mxu0 %v1355_v51  ;;  %875 = vmatprep.subr.bf16.mxu1 %v1358_v52 }
  0x6b   :  { %835 = vmatpush1.bf16.msra.mxu0 %v1353_v53  ;;  %876 = vmatpush1.bf16.msra.mxu1 %v1356_v54 }
  0x6c   :  { %836 = vmatprep.subr.bf16.mxu0 %v1361_v55  ;;  %877 = vmatprep.subr.bf16.mxu1 %v1364_v56  ;;  %v81_v56 = vld [vmem:[%s1976_s0 + $0x18] sm:$0xff] }
  0x6f   :  { %837 = vmatpush1.bf16.msra.mxu0 %v1359_v57  ;;  %878 = vmatpush1.bf16.msra.mxu1 %v1362_v58 }
  0x70   :  { %838 = vmatprep.subr.bf16.mxu0 %v1367_v59  ;;  %879 = vmatprep.subr.bf16.mxu1 %v1370_v60  ;;  %v378_v59 = vrot.slane %v361_v41, %v377_v50 }
  0x73   :  { %839 = vmatpush1.bf16.msra.mxu0 %v1365_v61  ;;  %880 = vmatpush1.bf16.msra.mxu1 %v1368_v62  ;;  %v373_v61 = vsub.s32 2, %v1840_v39 }
  0x74   :  { %840 = vmatprep.subr.bf16.mxu0 %v1373_v63  ;;  %881 = vmatprep.subr.bf16.mxu1 %v1376_v1  ;;  %v80_v63 = vld [vmem:[%s1976_s0 + $0x10] sm:$0xff] }
  0x77   :  { %841 = vmatpush1.bf16.msra.mxu0 %v1371_v2  ;;  %882 = vmatpush1.bf16.msra.mxu1 %v1374_v3 }
  0x78   :  { %842 = vmatprep.subr.bf16.mxu0 %v1379_v4  ;;  %883 = vmatprep.subr.bf16.mxu1 %v1382_v5 }
  0x7b   :  { %843 = vmatpush1.bf16.msra.mxu0 %v1377_v6  ;;  %884 = vmatpush1.bf16.msra.mxu1 %v1380_v7  ;;  %v374_v6 = vrot.slane %v361_v41, %v373_v61  ;;  %v1448_v41 = vld [vmem:[%s1982_s6 + $0x74] ss:$8 sps:$4 sm:$0xff]  }
  0x7c   :  { %844 = vmatprep.subr.bf16.mxu0 %v1385_v8  ;;  %885 = vmatprep.subr.bf16.mxu1 %v1388_v9 }
  0x7f   :  { %845 = vmatpush1.bf16.msra.mxu0 %v1383_v10  ;;  %886 = vmatpush1.bf16.msra.mxu1 %v1386_v11 }
  0x80   :  { %846 = vmatprep.subr.bf16.mxu0 %v1391_v12  ;;  %887 = vmatprep.subr.bf16.mxu1 %v1394_v13 }
  0x83   :  { %847 = vmatpush1.bf16.msra.mxu0 %v1389_v14  ;;  %888 = vmatpush1.bf16.msra.mxu1 %v1392_v15  ;;  %v77_v15 = vld [vmem:[#allocation5] sm:$0xff] }
  0x84   :  { %848 = vmatprep.subr.bf16.mxu0 %v1397_v16  ;;  %889 = vmatprep.subr.bf16.mxu1 %v1400_v17 }
  0x87   :  { %849 = vmatpush1.bf16.msra.mxu0 %v1395_v18  ;;  %890 = vmatpush1.bf16.msra.mxu1 %v1398_v19 }
  0x88   :  { %850 = vmatprep.subr.bf16.mxu0 %v1403_v20  ;;  %891 = vmatprep.subr.bf16.mxu1 %v1406_v21 }
  0x8b   :  { %851 = vmatpush1.bf16.msra.mxu0 %v1401_v22  ;;  %892 = vmatpush1.bf16.msra.mxu1 %v1404_v23 }
  0x8c   :  { %852 = vmatprep.subr.bf16.mxu0 %v1409_v25  ;;  %893 = vmatprep.subr.bf16.mxu1 %v1412_v27  ;;  %v1425_v27 = vld [vmem:[%s1982_s6] ss:$8 sps:$4 sm:$0xff]  }
  0x8f   :  { %853 = vmatpush1.bf16.msra.mxu0 %v1407_v24  ;;  %894 = vmatpush1.bf16.msra.mxu1 %v1410_v26  ;;  %v1427_v26 = vld [vmem:[%s1982_s6 + $0x4] ss:$8 sps:$4 sm:$0xff]  }
  0x90   :  { %854 = vmatprep.subr.bf16.mxu0 %v1415_v28  ;;  %895 = vmatprep.subr.bf16.mxu1 %v1418_v29  ;;  %v1430_v28 = vld [vmem:[%s1982_s6 + $0x14] ss:$8 sps:$4 sm:$0xff]   ;;  %v1428_v29 = vld [vmem:[%s1982_s6 + $0x10] ss:$8 sps:$4 sm:$0xff]  }
  0x93   :  { %855 = vmatpush1.bf16.msra.mxu0 %v1413_v30  ;;  %896 = vmatpush1.bf16.msra.mxu1 %v1416_v31  ;;  %v1431_v30 = vld [vmem:[%s1982_s6 + $0x20] ss:$8 sps:$4 sm:$0xff]   ;;  %v1436_v31 = vld [vmem:[%s1982_s6 + $0x34] ss:$8 sps:$4 sm:$0xff]  }
  0x94   :  { %856 = vmatprep.subr.bf16.mxu0 %v1421_v33  ;;  %897 = vmatprep.subr.bf16.mxu1 %v1424_v34  ;;  %v1439_v33 = vld [vmem:[%s1982_s6 + $0x44] ss:$8 sps:$4 sm:$0xff]   ;;  %v1437_v34 = vld [vmem:[%s1982_s6 + $0x40] ss:$8 sps:$4 sm:$0xff]  }
  0x97   :  { %857 = vmatpush1.bf16.msra.mxu0 %v1419_v36  ;;  %898 = vmatpush1.bf16.msra.mxu1 %v1422_v37  ;;  %v1440_v36 = vld [vmem:[%s1982_s6 + $0x50] ss:$8 sps:$4 sm:$0xff]   ;;  %v1445_v37 = vld [vmem:[%s1982_s6 + $0x64] ss:$8 sps:$4 sm:$0xff]  }
  0x98   :  { %1045 = vmatprep.subr.bf16.mxu0 %v1427_v26 }
 0x12d   :  { %v309_v46 = vpop.f32.mrb[0].mxu0  ;;  %v350_v58 = vpop.f32.mrb[0].mxu1 }
 0x12e   :  { %v357_v48 = vadd.f32 %v309_v46, %v78_v43  ;;  %v311_v49 = vpop.f32.mrb[1].mxu0  ;;  %v352_v62 = vpop.f32.mrb[1].mxu1  ;;  %v359_v5 = vadd.f32 %v350_v58, %v80_v63  ;;  %v1446_v43 = vld [vmem:[%s1982_s6 + $0x70] ss:$8 sps:$4 sm:$0xff]  }
 0x12f   :  { %v358_v51 = vadd.f32 %v311_v49, %v79_v45  ;;  %v313_v52 = vpop.f32.mrb[2].mxu0  ;;  %v360_v1 = vadd.f32 %v352_v62, %v81_v56  ;;  %v354_v2 = vpop.f32.mrb[2].mxu1 }
 0x130   :  { %v383_v53 = vadd.f32 %v366_v44, %v357_v48  ;;  %v314_v54 = vpop.f32.mrb[3].mxu0  ;;  %v355_v3 = vpop.f32.mrb[3].mxu1  ;;  %v385_v8 = vadd.f32 %v374_v6, %v359_v5  ;;  %v1186_v44 = vld [vmem:[%s1981_s5 + $0x4] sm:$0xf] }
 0x131   :  { %v384_v55 = vadd.f32 %v370_v47, %v358_v51  ;;  %v386_v4 = vadd.f32 %v378_v59, %v360_v1  ;;  %v489_v45 = vrot.slane %v1186_v44, %v1843_v40  ;;  %v493_v46 = vrot.slane %v1186_v44, %v1849_v42 }
 0x132   :  { %v1183_v57 = vmul.f32 -1.442695, %v383_v53  ;;  %v497_v63 = vrot.slane %v1186_v44, %v373_v61 }
 0x133   :  { %v1184_v60 = vmul.f32 -1.442695, %v384_v55  ;;  %v1185_v7 = vmul.f32 -1.442695, %v386_v4 }
 0x134   :  { %1449 = vpow2.f32 %v1183_v57 }
 0x135   :  { %1451 = vpow2.f32 %v1184_v60  ;;  %v501_v60 = vrot.slane %v1186_v44, %v377_v50 }
 0x136   :  { %1453 = vpow2.f32 %v1185_v7 }
 0x137   :  { %1455 = vtanh.f32 %v385_v8 }
 0x13e   :  { %v1450_v9 = vpop.eup %1449 }
 0x13f   :  { %v1452_v10 = vpop.eup %1451  ;;  %v390_v11 = vadd.f32 1.0, %v1450_v9  ;;  %v416_v9 = vld [vmem:[#allocation5 + $0x8] sm:$0xff] }
 0x140   :  { %v396_v12 = vadd.f32 1.0, %v1452_v10  ;;  %v1454_v13 = vpop.eup %1453 }
 0x141   :  { %1457 = vrcp.f32 %v390_v11  ;;  %v1456_v14 = vpop.eup %1455  ;;  %v403_v17 = vadd.f32 1.0, %v1454_v13 }
 0x142   :  { %1459 = vrcp.f32 %v396_v12 }
 0x143   :  { %1461 = vrcp.f32 %v403_v17  ;;  %v953_v17 = vld [vmem:[%s1983_s7] sm:$0x3]  ;;  %s1635_s7 = smov [#allocation9]  }
 0x144   :  { %s1119_s12 = sshll.u32 %s1635_s7, 4  ;;  %s1120_s12 = int_to_ptr.vmem [resolvable:$true] %s1119_s12 }
 0x145   :  { %s1553_s13 = scalar_lea.vmem %s1120_s12, 256  ;;  %p1558_p11 = scmp.lt.s32.totalorder %s1120_s12, %s1120_s12 }
 0x146   :  { %p1554_p10 = scmp.ne.s32.totalorder %s1120_s12, %s1553_s13  ;;  %p1559_p12 = scmp.lt.s32.totalorder %s1553_s13, %s1553_s13 }
 0x148   :  { %p1560_p13 = por %p1559_p12, %p1558_p11 }
 0x14a   :  { %p1561_p0 = pnand %p1560_p13, %p1554_p10 }
 0x14b   :  { %v1458_v16 = vpop.eup %1457 }
 0x14c   :  { %v1460_v18 = vpop.eup %1459  ;;  %v407_v19 = vmul.f32 %v1458_v16, %v1456_v14 }
 0x14d   :  { %v406_v20 = vmul.f32 %v1460_v18, %v77_v15  ;;  %v1462_v22 = vpop.eup %1461  ;;  %v958_v18 = vrot.slane %v953_v17, %v1843_v40 }
 0x14f   :  { %v408_v21 = vadd.f32 %v407_v19, %v406_v20  ;;  %v962_v19 = vrot.slane %v953_v17, %v1849_v42 }
 0x151   :  { %1463 = vtanh.f32 %v408_v21  ;;  %412 = vst [vmem:[#allocation11] sm:$0xff] %v408_v21 }
 0x15b   :  { %v1464_v23 = vpop.eup %1463 }
 0x15c   :  { %v410_v24 = vmul.f32 %v1464_v23, %v1462_v22 }
 0x15e   :  { %v417_v25 = vpack.c.bf16 %v410_v24, %v410_v24  ;;  %411 = vst [vmem:[#allocation9] sm:$0xff] %v410_v24 }
 0x160   :  { %859 = vmatmul.mubr.bf16.vlgmr.msra.gmra.mrb[4].mxu0 %v417_v25  ;;  %900 = vmatmul.mubr.bf16.vlgmr.msra.gmra.mrb[4].mxu1 %v417_v25 }
 0x161   :  { %1077 = vmatprep.mubr.bf16.mxu0 %v1634_v0  ;;  %1046 = vmatpush1.bf16.msra.mxu0 %v1425_v27  ;;  %v1433_v0 = vld [vmem:[%s1982_s6 + $0x24] ss:$8 sps:$4 sm:$0xff]  }
 0x162   :  { %1047 = vmatprep.subr.bf16.mxu0 %v1430_v28 }
 0x165   :  { %1048 = vmatpush1.bf16.msra.mxu0 %v1428_v29 }
 0x166   :  { %1049 = vmatprep.subr.bf16.mxu0 %v1433_v0 }
 0x169   :  { %1050 = vmatpush1.bf16.msra.mxu0 %v1431_v30 }
 0x16a   :  { %1051 = vmatprep.subr.bf16.mxu0 %v1436_v31 }
 0x16d   :  { %1052 = vmatpush1.bf16.msra.mxu0 %v1434_v32 }
 0x16e   :  { %1053 = vmatprep.subr.bf16.mxu0 %v1439_v33 }
 0x171   :  { %1054 = vmatpush1.bf16.msra.mxu0 %v1437_v34 }
 0x172   :  { %1055 = vmatprep.subr.bf16.mxu0 %v1442_v35 }
 0x175   :  { %1056 = vmatpush1.bf16.msra.mxu0 %v1440_v36 }
 0x176   :  { %1057 = vmatprep.subr.bf16.mxu0 %v1445_v37 }
 0x179   :  { %1058 = vmatpush1.bf16.msra.mxu0 %v1443_v38 }
 0x17a   :  { %1059 = vmatprep.subr.bf16.mxu0 %v1448_v41 }
 0x17d   :  { %1060 = vmatpush1.bf16.msra.mxu0 %v1446_v43 }
 0x233   :  { %v860_v47 = vpop.f32.mrb[4].mxu0  ;;  %v901_v48 = vpop.f32.mrb[4].mxu1 }
 0x234   :  { %v861_v49 = vadd.f32 %v860_v47, %v489_v45  ;;  %v862_v51 = vpop.f32.mrb[5].mxu0  ;;  %v903_v52 = vpop.f32.mrb[5].mxu1  ;;  %v902_v2 = vadd.f32 %v901_v48, %v497_v63 }
 0x235   :  { %v863_v53 = vadd.f32 %v862_v51, %v493_v46  ;;  %v864_v54 = vpop.f32.mrb[6].mxu0  ;;  %v905_v55 = vpop.f32.mrb[6].mxu1  ;;  %v904_v62 = vadd.f32 %v903_v52, %v501_v60 }
 0x236   :  { %v1251_v56 = vmul.f32 -1.442695, %v861_v49  ;;  %v865_v57 = vpop.f32.mrb[7].mxu0  ;;  %v906_v58 = vpop.f32.mrb[7].mxu1 }
 0x237   :  { %v1252_v59 = vmul.f32 -1.442695, %v863_v53  ;;  %v1253_v1 = vmul.f32 -1.442695, %v904_v62 }
 0x238   :  { %1465 = vpow2.f32 %v1251_v56 }
 0x239   :  { %1467 = vpow2.f32 %v1252_v59 }
 0x23a   :  { %1469 = vpow2.f32 %v1253_v1 }
 0x23b   :  { %1471 = vtanh.f32 %v902_v2 }
 0x242   :  { %v1466_v3 = vpop.eup %1465 }
 0x243   :  { %v1468_v4 = vpop.eup %1467  ;;  %v911_v5 = vadd.f32 1.0, %v1466_v3 }
 0x244   :  { %v917_v6 = vadd.f32 1.0, %v1468_v4  ;;  %v1470_v7 = vpop.eup %1469 }
 0x245   :  { %1473 = vrcp.f32 %v911_v5  ;;  %v1472_v8 = vpop.eup %1471  ;;  %v924_v12 = vadd.f32 1.0, %v1470_v7 }
 0x246   :  { %1475 = vrcp.f32 %v917_v6 }
 0x247   :  { %1477 = vrcp.f32 %v924_v12 }
 0x24f   :  { %v1474_v50 = vpop.eup %1473 }
 0x250   :  { %v1476_v10 = vpop.eup %1475  ;;  %v928_v11 = vmul.f32 %v1474_v50, %v1472_v8 }
 0x251   :  { %v927_v13 = vmul.f32 %v1476_v10, %v416_v9  ;;  %v1478_v61 = vpop.eup %1477 }
 0x253   :  { %v929_v39 = vadd.f32 %v928_v11, %v927_v13 }
 0x255   :  { %1479 = vtanh.f32 %v929_v39  ;;  %935 = vst [vmem:[#allocation11 + $0x8] sm:$0xff] %v929_v39 }
 0x25f   :  { %v1480_v14 = vpop.eup %1479 }
 0x260   :  { %v931_v15 = vmul.f32 %v1480_v14, %v1478_v61 }
 0x262   :  { %v936_v16 = vpack.c.bf16 %v931_v15, %v931_v15  ;;  %933 = vst [vmem:[#allocation9 + $0x8] sm:$0xff] %v931_v15 }
 0x264   :  { %1078 = vmatmul.mubr.bf16.vlgmr.msra.gmra.mrb[8].mxu0 %v936_v16 }
 0x337   :  { %v1079_v20 = vpop.f32.mrb[8].mxu0 }
 0x338   :  { %v1080_v21 = vadd.f32 %v1079_v20, %v958_v18  ;;  %v1081_v22 = vpop.f32.mrb[9].mxu0 }
 0x339   :  { %v1082_v23 = vadd.f32 %v1081_v22, %v962_v19  ;;  %v1083_v24 = vpop.f32.mrb[10].mxu0 }
 0x33a   :  { %v1084_v25 = vpop.f32.mrb[11].mxu0 }
 0x33b   :  { %v1086_v26 = vmax.f32 %v1080_v21, %v1082_v23 }
 0x33d   :  { %1087 = vmax.xlane.f32.xlu0 %v1086_v26 }
 0x3ca   :  { %v1088_v27 = vpop.xlane.xlu0 %1087 }
 0x3cb   :  { %v1089_v28 = vsub.f32 %v1080_v21, %v1088_v27  ;;  %v1090_v29 = vsub.f32 %v1082_v23, %v1088_v27 }
 0x3cd   :  { %v1091_v0 = vmul.f32 1.442695, %v1089_v28  ;;  %v1093_v30 = vmul.f32 1.442695, %v1090_v29 }
 0x3cf   :  { %1481 = vpow2.f32 %v1091_v0 }
 0x3d0   :  { %1483 = vpow2.f32 %v1093_v30 }
 0x3d9   :  { %v1482_v31 = vpop.eup %1481 }
 0x3da   :  { %v1484_v32 = vpop.eup %1483 }
 0x3db   :  { %v1095_v40 = vadd.f32 %v1484_v32, %v1482_v31 }
 0x3dd   :  { %1096 = vadd.xlane.f32.xlu0 %v1095_v40 }
 0x3de   :  { %1564 = shalt.err (!%p1561_p0)
}
 0x3df   :  { %s1565_s17 = scalar_lea.hbm %s1985_s9, 256 }
 0x3e0   :  { %p1566_p1 = scmp.ne.s32.totalorder %s1985_s9, %s1565_s17  ;;  %p1569_p2 = scmp.lt.u32.totalorder %s1565_s17, %s1985_s9 }
 0x3e2   :  { %p1571_p3 = pnand %p1569_p2, %p1566_p1 }
 0x3e4   :  { %1574 = shalt.err (!%p1571_p3)
}
 0x3e5   :  { %1125 = dma.vmem_to_hbm [thread:$0]  %s1120_s12, 256, %s1985_s9, [#allocation10], %s1629_s25, %s1629_s25, %s1630_s26  }
 0x3e6   :  { %s1636_s21 = smov [#allocation11]  }
 0x3e7   :  { %s1131_s0 = sshll.u32 %s1636_s21, 4  ;;  %s1132_s0 = int_to_ptr.vmem [resolvable:$true] %s1131_s0 }
 0x3e8   :  { %s1575_s22 = scalar_lea.vmem %s1132_s0, 256  ;;  %p1580_p5 = scmp.lt.s32.totalorder %s1132_s0, %s1132_s0 }
 0x3e9   :  { %p1576_p4 = scmp.ne.s32.totalorder %s1132_s0, %s1575_s22  ;;  %p1581_p6 = scmp.lt.s32.totalorder %s1575_s22, %s1575_s22 }
 0x3eb   :  { %p1582_p7 = por %p1581_p6, %p1580_p5 }
 0x3ed   :  { %p1583_p8 = pnand %p1582_p7, %p1576_p4 }
 0x3ef   :  { %1586 = shalt.err (!%p1583_p8)
}
 0x3f0   :  { %s1587_s27 = scalar_lea.hbm %s1986_s10, 256 }
 0x3f1   :  { %p1588_p9 = scmp.ne.s32.totalorder %s1986_s10, %s1587_s27  ;;  %p1591_p10 = scmp.lt.u32.totalorder %s1587_s27, %s1986_s10 }
 0x3f3   :  { %p1593_p11 = pnand %p1591_p10, %p1588_p9 }
 0x3f5   :  { %1596 = shalt.err (!%p1593_p11)
}
 0x3f6   :  { %1137 = dma.vmem_to_hbm [thread:$0]  %s1132_s0, 256, %s1986_s10, [#allocation10], %s1629_s25, %s1629_s25, %s1630_s26  }
 0x3f7   :  { %s1637_s11 = smov [#allocation8]  }
 0x3f8   :  { %s1110_s5 = sshll.u32 %s1637_s11, 4  ;;  %s1111_s5 = int_to_ptr.vmem [resolvable:$true] %s1110_s5 }
 0x3f9   :  { %s1597_s6 = scalar_lea.vmem %s1111_s5, 256  ;;  %p1602_p13 = scmp.lt.s32.totalorder %s1111_s5, %s1111_s5 }
 0x3fa   :  { %p1598_p12 = scmp.ne.s32.totalorder %s1111_s5, %s1597_s6  ;;  %p1603_p0 = scmp.lt.s32.totalorder %s1597_s6, %s1597_s6 }
 0x3fc   :  { %p1604_p1 = por %p1603_p0, %p1602_p13 }
 0x3fe   :  { %p1605_p2 = pnand %p1604_p1, %p1598_p12 }
 0x46a   :  { %v1097_v42 = vpop.xlane.xlu0 %1096 }
 0x46b   :  { %1485 = vlog2.f32 %v1097_v42 }
 0x475   :  { %v1486_v33 = vpop.eup %1485 }
 0x476   :  { %v1099_v34 = vmul.f32 0.6931472, %v1486_v33 }
 0x478   :  { %v1100_v35 = vsub.f32 %v1089_v28, %v1099_v34  ;;  %v1101_v36 = vsub.f32 %v1090_v29, %v1099_v34 }
 0x47a   :  { %1102 = vst [vmem:[#allocation8] sm:$0xff] %v1100_v35  ;;  %1103 = vst [vmem:[#allocation8 + $0x8] sm:$0xff] %v1101_v36 }
 0x47b   :  { %1608 = shalt.err (!%p1605_p2)
}
 0x47c   :  { %s1609_s25 = scalar_lea.hbm %s1984_s8, 256 }
 0x47d   :  { %p1610_p3 = scmp.ne.s32.totalorder %s1984_s8, %s1609_s25  ;;  %p1613_p4 = scmp.lt.u32.totalorder %s1609_s25, %s1984_s8 }
 0x47f   :  { %p1615_p5 = pnand %p1613_p4, %p1610_p3 }
 0x481   :  { %1618 = shalt.err (!%p1615_p5)
}
 0x482   :  { %1113 = dma.vmem_to_hbm [thread:$0]  %s1111_s5, 256, %s1984_s8, [#allocation4]  }
 0x483   :  { %1623 = dma.done.wait [#allocation4], 256  }
 0x484   :  { %1624 = vsyncadd [#allocation4], 4294967040 }
 0x485   :  { %1625 = dma.done.wait [#allocation10], 512  }
 0x486   :  { %1626 = vsyncadd [#allocation10], 4294966784 }
 0x487   :  { %1147 = vsyncpa [#allocation3], 1 }
 0x488   :  { %1148 = vsyncpa [#allocation6], 1 }
 0x489   :  { %1149 = vsyncpa [#allocation4], 1 }
 0x48a   :  { %1150 = vsyncpa [#allocation10], 1 }

</bundles_post_ra>
